<compile_context>
chip_gen: v6e
topology: v6e:2x2x1
jax: 0.10.0
libtpu: 0.0.40
codegen_flags: <defaults>
</compile_context>

<pallas_src>
import math

import jax
import jax.numpy as jnp
from jax.experimental import pallas as pl
from jax.experimental.pallas import tpu as pltpu


def _mean_pool_kernel(h_ref, m_ref, o_ref, acc_ref, cnt_ref):
    # h_ref:   (TB, TS, H)   hidden-state tile, native dtype (no f32 copy)
    # m_ref:   (TB, 1,  TS)  lane-dense mask tile, same dtype as h
    # o_ref:   (TB, 1,  H)   float32 output block (resident across the S axis)
    # acc_ref: (TB, 1,  H)   f32 scratch: running sum of masked embeddings
    # cnt_ref: (TB, 1,  1)   f32 scratch: running sum of the mask
    k = pl.program_id(1)

    @pl.when(k == 0)
    def _init():
        acc_ref[...] = jnp.zeros_like(acc_ref)
        cnt_ref[...] = jnp.zeros_like(cnt_ref)

    m = m_ref[...]  # (TB, 1, TS)

    # Masked sum over this S tile as a batched MXU contraction with f32
    # accumulation (the multiply+reduce stays off the VPU/XLU slots and no
    # f32 copy of the h tile is ever materialized).
    acc_ref[...] += jnp.einsum(
        "bqs,bsh->bqh", m, h_ref[...], preferred_element_type=jnp.float32
    )
    # Mask count for this tile (lane reduction, tiny).
    cnt_ref[...] += jnp.sum(m.astype(jnp.float32), axis=2, keepdims=True)

    @pl.when(k == pl.num_programs(1) - 1)
    def _finalize():
        # torch.clamp(min=1e-9), applied once after the full-S reduction.
        denom = jnp.maximum(cnt_ref[...], 1e-9)            # (TB, 1, 1)
        inv = pl.reciprocal(denom, approx=True)            # EUP reciprocal
        inv = inv * (2.0 - denom * inv)                     # 1 Newton step -> f32-accurate
        o_ref[...] = acc_ref[...] * inv                     # broadcast over H


def _pick_block_sizes(B, S, H, itemsize, target_block_bytes):
    """Pick (TB, TS) so each h tile is ~target bytes and tiles divide (B, S)."""
    # Batch tile: multiple of 8 when possible (sublane-friendly), always divides B.
    block_b = math.gcd(B, 8)
    # Sequence tile: must be a multiple of 128 (mask lane dim / h sublane dim)
    # unless it covers the full S.
    if S % 128 == 0:
        ts = (target_block_bytes // (block_b * H * itemsize)) // 128 * 128
        ts = int(min(max(ts, 128), S))
        while S % ts:
            ts -= 128
        block_s = ts
    else:
        block_s = S  # small / irregular S: single reduction step
    return block_b, block_s


def mean_pooling(
    last_hidden_state: jax.Array,
    attention_mask: jax.Array,
    *,
    block_b: int | None = None,
    block_s: int | None = None,
    # ~2 MiB h tiles: safe for v5e's 16 MiB scoped VMEM and v7x's 64 MiB
    # physical VMEM with double buffering; on v6e this can be raised to
    # 4-8 MiB to amortize the ~0.35 us per-grid-step overhead.
    target_block_bytes: int = 2 << 20,
) -> jax.Array:
    """Masked mean pooling. last_hidden_state: [B, S, H]; attention_mask: [B, S]."""
    B, S, H = last_hidden_state.shape
    assert attention_mask.shape == (B, S)

    itemsize = jnp.dtype(last_hidden_state.dtype).itemsize
    auto_tb, auto_ts = _pick_block_sizes(B, S, H, itemsize, target_block_bytes)
    tb = auto_tb if block_b is None else block_b
    ts = auto_ts if block_s is None else block_s
    assert B % tb == 0 and S % ts == 0

    # Lane-dense mask layout [B, 1, S]: one contiguous DMA row per batch entry
    # (no minor-dim-1 strided descriptors, no 128x lane padding) and it feeds
    # the MXU contraction directly.  0/1 mask is exact in any float dtype.
    mask3 = attention_mask.reshape(B, 1, S).astype(last_hidden_state.dtype)

    grid = (B // tb, S // ts)

    out3 = pl.pallas_call(
        _mean_pool_kernel,
        out_shape=jax.ShapeDtypeStruct((B, 1, H), jnp.float32),
        grid_spec=pltpu.PrefetchScalarGridSpec(
            num_scalar_prefetch=0,
            grid=grid,
            in_specs=[
                pl.BlockSpec((tb, ts, H), lambda i, k: (i, k, 0)),
                pl.BlockSpec((tb, 1, ts), lambda i, k: (i, 0, k)),
            ],
            out_specs=pl.BlockSpec((tb, 1, H), lambda i, k: (i, 0, 0)),
            scratch_shapes=[
                pltpu.VMEM((tb, 1, H), jnp.float32),   # sum_embeddings accumulator
                pltpu.VMEM((tb, 1, 1), jnp.float32),   # sum_mask accumulator
            ],
        ),
        compiler_params=pltpu.CompilerParams(
            # Batch axis parallel (2-TC sharding on v7x; harmless on v5e/v6e),
            # sequence axis is the reduction -> "arbitrary".
            dimension_semantics=("parallel", "arbitrary"),
        ),
    )(last_hidden_state, mask3)

    return out3.reshape(B, H)  # drop the singleton dim (bitcast-level reshape)


def mean_pooling_ref(last_hidden_state, attention_mask):
    """Pure-JAX reference matching the PyTorch forward."""
    m = attention_mask[..., None].astype(jnp.float32)
    sum_emb = jnp.sum(last_hidden_state.astype(jnp.float32) * m, axis=1)
    sum_mask = jnp.clip(jnp.sum(m, axis=1), 1e-9, None)
    return sum_emb / sum_mask


if __name__ == "__main__":
    key = jax.random.PRNGKey(0)
    k1, k2, k3, k4 = jax.random.split(key, 4)

    # --- small shape consistent with the module: batch=2, seq=8, hidden=32 ---
    B, S, H = 2, 8, 32
    h = jax.random.normal(k1, (B, S, H), dtype=jnp.float32)
    # Quantize test activations to bf16-representable f32 so the check is
    # insensitive to whether the MXU evaluates f32 matmuls natively or via
    # bf16 passes; the kernel itself always accumulates in f32.
    h = h.astype(jnp.bfloat16).astype(jnp.float32)
    mask = (jax.random.uniform(k2, (B, S)) > 0.3).astype(jnp.float32)

    out = jax.block_until_ready(mean_pooling(h, mask))
    ref = mean_pooling_ref(h, mask)
    assert out.shape == (B, H) and out.dtype == jnp.float32
    assert jnp.allclose(out, ref, atol=1e-4, rtol=1e-4), "small-case mismatch"

    # --- larger case exercising the (batch-parallel, seq-reduction) grid ---
    B2, S2, H2 = 16, 512, 256   # -> TB=8, TS=256, grid=(2, 2)
    h2 = jax.random.normal(k3, (B2, S2, H2), dtype=jnp.float32)
    h2 = h2.astype(jnp.bfloat16).astype(jnp.float32)
    mask2 = (jax.random.uniform(k4, (B2, S2)) > 0.5).astype(jnp.float32)
    mask2 = mask2.at[0].set(0.0)  # fully-masked row exercises the clamp path

    out2 = jax.block_until_ready(mean_pooling(h2, mask2))
    ref2 = mean_pooling_ref(h2, mask2)
    assert jnp.allclose(out2, ref2, atol=1e-4, rtol=1e-4), "large-case mismatch"

    print("KERNEL_OK")
</pallas_src>

<mosaic_0001>
module attributes {stable_mosaic.version = 11 : i64} {
  func.func @_mean_pool_kernel(%arg0: i32, %arg1: i32, %arg2: memref<2x8x32xf32, #tpu.memory_space<vmem>>, %arg3: memref<2x1x8xf32, #tpu.memory_space<vmem>>, %arg4: memref<2x1x32xf32, #tpu.memory_space<vmem>>, %arg5: memref<2x1x32xf32, #tpu.memory_space<vmem>>, %arg6: memref<2x1x1xf32, #tpu.memory_space<vmem>>) attributes {dimension_semantics = [#tpu.dimension_semantics<parallel>, #tpu.dimension_semantics<arbitrary>], iteration_bounds = array<i64: 1, 1>, scalar_prefetch = 0 : i64, scratch_operands = 2 : i64, tpu.core_type = #tpu.core_type<tc>, window_params = [{transform_indices = @transform_0, window_bounds = array<i64: 2, 8, 32>}, {transform_indices = @transform_1, window_bounds = array<i64: 2, 1, 8>}, {transform_indices = @transform_2, window_bounds = array<i64: 2, 1, 32>}]} {
    %c0_i32 = arith.constant 0 : i32
    %0 = arith.cmpi eq, %arg1, %c0_i32 : i32
    %1 = arith.extui %0 : i1 to i32
    %c0_i32_0 = arith.constant 0 : i32
    %2 = arith.cmpi ne, %1, %c0_i32_0 : i32
    scf.if %2 {
      %cst_21 = arith.constant 0.000000e+00 : f32
      %17 = vector.broadcast %cst_21 : f32 to vector<2x1x32xf32>
      %c0_22 = arith.constant 0 : index
      %c0_23 = arith.constant 0 : index
      %c0_24 = arith.constant 0 : index
      %18 = vector.load %arg5[%c0_22, %c0_23, %c0_24] : memref<2x1x32xf32, #tpu.memory_space<vmem>>, vector<2x1x32xf32>
      tpu.vector_store %arg5[%c0_22, %c0_23, %c0_24], %17 {strides = array<i32>} : memref<2x1x32xf32, #tpu.memory_space<vmem>>, vector<2x1x32xf32>,
      %cst_25 = arith.constant 0.000000e+00 : f32
      %19 = vector.broadcast %cst_25 : f32 to vector<2x1x1xf32>
      %c0_26 = arith.constant 0 : index
      %c0_27 = arith.constant 0 : index
      %c0_28 = arith.constant 0 : index
      %20 = vector.load %arg6[%c0_26, %c0_27, %c0_28] : memref<2x1x1xf32, #tpu.memory_space<vmem>>, vector<2x1x1xf32>
      tpu.vector_store %arg6[%c0_26, %c0_27, %c0_28], %19 {strides = array<i32>} : memref<2x1x1xf32, #tpu.memory_space<vmem>>, vector<2x1x1xf32>,
    } else {
    }
    %c0 = arith.constant 0 : index
    %c0_1 = arith.constant 0 : index
    %c0_2 = arith.constant 0 : index
    %3 = vector.load %arg3[%c0, %c0_1, %c0_2] : memref<2x1x8xf32, #tpu.memory_space<vmem>>, vector<2x1x8xf32>
    %c0_3 = arith.constant 0 : index
    %c0_4 = arith.constant 0 : index
    %c0_5 = arith.constant 0 : index
    %4 = vector.load %arg5[%c0_3, %c0_4, %c0_5] : memref<2x1x32xf32, #tpu.memory_space<vmem>>, vector<2x1x32xf32>
    %c0_6 = arith.constant 0 : index
    %c0_7 = arith.constant 0 : index
    %c0_8 = arith.constant 0 : index
    %5 = vector.load %arg2[%c0_6, %c0_7, %c0_8] : memref<2x8x32xf32, #tpu.memory_space<vmem>>, vector<2x8x32xf32>
    "tpu.trace_start"() <{level = 10 : i32, message = "bqs,bsh->bqh"}> : () -> ()
    %cst = arith.constant dense<0.000000e+00> : vector<2x1x32xf32>
    %6 = tpu.matmul %3, %5, %cst {dimension_numbers = #tpu.dot_dimension_numbers<[2], [1], [1], [2], [0, 0, 0, 1, 1, 2], [0], [0]>} : vector<2x1x8xf32>, vector<2x8x32xf32>, vector<2x1x32xf32> -> vector<2x1x32xf32>
    "tpu.trace_stop"() : () -> ()
    %7 = arith.addf %4, %6 : vector<2x1x32xf32>
    %c0_9 = arith.constant 0 : index
    %c0_10 = arith.constant 0 : index
    %c0_11 = arith.constant 0 : index
    %8 = vector.load %arg5[%c0_9, %c0_10, %c0_11] : memref<2x1x32xf32, #tpu.memory_space<vmem>>, vector<2x1x32xf32>
    tpu.vector_store %arg5[%c0_9, %c0_10, %c0_11], %7 {strides = array<i32>} : memref<2x1x32xf32, #tpu.memory_space<vmem>>, vector<2x1x32xf32>,
    %c0_12 = arith.constant 0 : index
    %c0_13 = arith.constant 0 : index
    %c0_14 = arith.constant 0 : index
    %9 = vector.load %arg6[%c0_12, %c0_13, %c0_14] : memref<2x1x1xf32, #tpu.memory_space<vmem>>, vector<2x1x1xf32>
    %cst_15 = arith.constant dense<0.000000e+00> : vector<2x1xf32>
    %10 = vector.multi_reduction <add>, %3, %cst_15 [2] : vector<2x1x8xf32> to vector<2x1xf32>
    %11 = vector.shape_cast %10 : vector<2x1xf32> to vector<2x1x1xf32>
    %12 = arith.addf %9, %11 : vector<2x1x1xf32>
    %c0_16 = arith.constant 0 : index
    %c0_17 = arith.constant 0 : index
    %c0_18 = arith.constant 0 : index
    %13 = vector.load %arg6[%c0_16, %c0_17, %c0_18] : memref<2x1x1xf32, #tpu.memory_space<vmem>>, vector<2x1x1xf32>
    tpu.vector_store %arg6[%c0_16, %c0_17, %c0_18], %12 {strides = array<i32>} : memref<2x1x1xf32, #tpu.memory_space<vmem>>, vector<2x1x1xf32>,
    %c0_i32_19 = arith.constant 0 : i32
    %14 = arith.cmpi eq, %arg1, %c0_i32_19 : i32
    %15 = arith.extui %14 : i1 to i32
    %c0_i32_20 = arith.constant 0 : i32
    %16 = arith.cmpi ne, %15, %c0_i32_20 : i32
    scf.if %16 {
      %c0_21 = arith.constant 0 : index
      %c0_22 = arith.constant 0 : index
      %c0_23 = arith.constant 0 : index
      %17 = vector.load %arg6[%c0_21, %c0_22, %c0_23] : memref<2x1x1xf32, #tpu.memory_space<vmem>>, vector<2x1x1xf32>
      %cst_24 = arith.constant 9.99999971E-10 : f32
      %18 = vector.broadcast %cst_24 : f32 to vector<2x1x1xf32>
      %19 = arith.maximumf %17, %18 : vector<2x1x1xf32>
      %20 = tpu.reciprocal %19 {approx = true} : vector<2x1x1xf32> -> vector<2x1x1xf32>
      %21 = arith.mulf %19, %20 : vector<2x1x1xf32>
      %cst_25 = arith.constant 2.000000e+00 : f32
      %22 = vector.broadcast %cst_25 : f32 to vector<2x1x1xf32>
      %23 = arith.subf %22, %21 : vector<2x1x1xf32>
      %24 = arith.mulf %20, %23 : vector<2x1x1xf32>
      %c0_26 = arith.constant 0 : index
      %c0_27 = arith.constant 0 : index
      %c0_28 = arith.constant 0 : index
      %25 = vector.load %arg5[%c0_26, %c0_27, %c0_28] : memref<2x1x32xf32, #tpu.memory_space<vmem>>, vector<2x1x32xf32>
      %26 = vector.broadcast %24 : vector<2x1x1xf32> to vector<2x1x32xf32>
      %27 = arith.mulf %25, %26 : vector<2x1x32xf32>
      %c0_29 = arith.constant 0 : index
      %c0_30 = arith.constant 0 : index
      %c0_31 = arith.constant 0 : index
      %28 = vector.load %arg4[%c0_29, %c0_30, %c0_31] : memref<2x1x32xf32, #tpu.memory_space<vmem>>, vector<2x1x32xf32>
      tpu.vector_store %arg4[%c0_29, %c0_30, %c0_31], %27 {strides = array<i32>} : memref<2x1x32xf32, #tpu.memory_space<vmem>>, vector<2x1x32xf32>,
    } else {
    }
    return
  }
  func.func @transform_0(%arg0: i32, %arg1: i32) -> (i32, i32, i32) {
    %c0_i32 = arith.constant 0 : i32
    %c0_i32_0 = arith.constant 0 : i32
    return %arg0, %arg1, %c0_i32 : i32, i32, i32
  }
  func.func @transform_1(%arg0: i32, %arg1: i32) -> (i32, i32, i32) {
    %c0_i32 = arith.constant 0 : i32
    %c0_i32_0 = arith.constant 0 : i32
    return %arg0, %c0_i32, %arg1 : i32, i32, i32
  }
  func.func @transform_2(%arg0: i32, %arg1: i32) -> (i32, i32, i32) {
    %c0_i32 = arith.constant 0 : i32
    %c0_i32_0 = arith.constant 0 : i32
    %c0_i32_1 = arith.constant 0 : i32
    return %arg0, %c0_i32, %c0_i32_0 : i32, i32, i32
  }
}

</mosaic_0001>

<bundles_post_ra>
// kernel: tpu_custom_call.1
= control target key start
LH: loop header
LB: loop body
LE: loop exit
PB: predicated region body
PF: predicated region fallthrough
CT: control target
= control target key end

     0   :  { %7 = vsyncpa [#allocation5], 0  ;;  %s427_s0 = inlined_call_operand.hbm [shape: f32[2,8,32], index: 0, kind: input, shape index: {}]   ;;  %s428_s1 = inlined_call_operand.hbm [shape: f32[2,1,8], index: 1, kind: input, shape index: {}]   ;;  %s429_s2 = inlined_call_operand.hbm [shape: f32[2,1,32], index: 2, kind: output, shape index: {}]  }
   0x1   :  { %8 = vsyncpa [#allocation8], 0 }
   0x2   :  { %9 = vsyncpa [#allocation6], 0  ;;  %s377_s9 = smov [#allocation4]  }
   0x3   :  { %s15_s10 = sshll.u32 %s377_s9, 4  ;;  %s16_s10 = int_to_ptr.vmem [resolvable:$true] %s15_s10 }
   0x4   :  { %s319_s11 = scalar_lea.vmem %s16_s10, 256  ;;  %p324_p1 = scmp.lt.s32.totalorder %s16_s10, %s16_s10 }
   0x5   :  { %p320_p0 = scmp.ne.s32.totalorder %s16_s10, %s319_s11  ;;  %p325_p2 = scmp.lt.s32.totalorder %s319_s11, %s319_s11 }
   0x7   :  { %p326_p3 = por %p325_p2, %p324_p1 }
   0x9   :  { %p327_p4 = pnand %p326_p3, %p320_p0 }
   0xb   :  { %330 = shalt.err (!%p327_p4)
}
   0xc   :  { %s378_s12 = smov 128   ;;  %s379_s13 = smov 8  }
   0xd   :  { %21 = dma.hbm_to_vmem [thread:$0]  %s427_s0, 256, %s16_s10, [#allocation5], %s378_s12, %s378_s12, %s379_s13  }
   0xe   :  { %s380_s16 = smov [#allocation7]  }
   0xf   :  { %s27_s17 = sshll.u32 %s380_s16, 4  ;;  %s28_s17 = int_to_ptr.vmem [resolvable:$true] %s27_s17 }
  0x10   :  { %s339_s18 = scalar_lea.vmem %s28_s17, 32  ;;  %p344_p6 = scmp.lt.s32.totalorder %s28_s17, %s28_s17 }
  0x11   :  { %p340_p5 = scmp.ne.s32.totalorder %s28_s17, %s339_s18  ;;  %p345_p7 = scmp.lt.s32.totalorder %s339_s18, %s339_s18 }
  0x13   :  { %p346_p8 = por %p345_p7, %p344_p6 }
  0x15   :  { %p347_p9 = pnand %p346_p8, %p340_p5 }
  0x17   :  { %350 = shalt.err (!%p347_p9)
}
  0x18   :  { %s381_s19 = smov 16   ;;  %s382_s20 = smov 1  }
  0x19   :  { %33 = dma.hbm_to_vmem [thread:$0]  %s428_s1, 32, %s28_s17, [#allocation8], %s381_s19, %s381_s19, %s382_s20  }
  0x1a   :  { %371 = dma.done.wait [#allocation5], 256  }
  0x1b   :  { %372 = vsyncadd [#allocation5], 4294967040 }
  0x1c   :  { %373 = dma.done.wait [#allocation8], 32  }
  0x1d   :  { %374 = vsyncadd [#allocation8], 4294967264  ;;  %v383_v0 = vmov 0.0   ;;  %vm384_vm0 = vmmov 0   ;;  %vm47_vm1 = vcmask 0   ;;  %vm210_vm2 = vcmask 57344  }
  0x1e   :  { %285 = vmatprep.subr.mxu0 %v383_v0  ;;  %287 = vmatprep.mubr.msk.f32.mxu0 %vm384_vm0, %v383_v0  ;;  %48 = vst.msk [vmem:[#allocation3] sm:$0x1] %vm47_vm1, %v383_v0  ;;  %49 = vst.msk [vmem:[#allocation3 + $0x1] sm:$0x1] %vm47_vm1, %v383_v0  ;;  %vm56_vm3 = vcmask 64512   ;;  %v54_v3 = vld [vmem:[#allocation4] sm:$0xff]  ;;  %v244_v34 = vlaneseq }
  0x1f   :  { %290 = vmatprep.subr.mxu1 %v383_v0  ;;  %292 = vmatprep.mubr.msk.f32.mxu1 %vm384_vm0, %v383_v0  ;;  %v50_v1 = vld [vmem:[#allocation7] sm:$0x1]  ;;  %v51_v2 = vld [vmem:[#allocation7 + $0x1] sm:$0x1]  ;;  %v55_v5 = vld [vmem:[#allocation4 + $0x8] sm:$0xff]  ;;  %v385_v7 = vmov 0  }
  0x20   :  { %v211_v4 = vsel %vm210_vm2, %v50_v1, 0.0  ;;  %286 = vmatpush3.msra.mxu0 %v54_v3  ;;  %v214_v6 = vsel %vm210_vm2, %v51_v2, 0.0  ;;  %291 = vmatpush3.msra.mxu1 %v55_v5  ;;  %vm44_vm4 = vcmask 253952   ;;  %v245_v35 = vshrl.u32 %v244_v34, 7  ;;  %s386_s0 = smov [#allocation9]  }
  0x21   :  { %212 = vadd.xlane.f32.xlu0 %v211_v4  ;;  %288 = vmatmul.mubr.msk.f32.vlgmr.msra.gmra.mxu0 %vm56_vm3, %v50_v1  ;;  %45 = vst.msk [vmem:[#allocation2] sm:$0x1] %vm44_vm4, %v383_v0  ;;  %46 = vst.msk [vmem:[#allocation2 + $0x1] sm:$0x1] %vm44_vm4, %v383_v0  ;;  %s266_s1 = sshll.u32 %s386_s0, 4  ;;  %s267_s1 = int_to_ptr.vmem [resolvable:$true] %s266_s1 }
  0x22   :  { %293 = vmatmul.mubr.msk.f32.vlgmr.msra.gmra.mxu1 %vm56_vm3, %v51_v2  ;;  %305 = vset.pattern.permute.xlu1 %v385_v7  ;;  %v246_v36 = vsub.s32 0, %v245_v35  ;;  %s351_s23 = scalar_lea.vmem %s267_s1, 32  ;;  %p356_p11 = scmp.lt.s32.totalorder %s267_s1, %s267_s1 }
  0x23   :  { %306 = vset.pattern.permute.xlu0 %v385_v7  ;;  %p352_p10 = scmp.ne.s32.totalorder %s267_s1, %s351_s23  ;;  %p357_p12 = scmp.lt.s32.totalorder %s351_s23, %s351_s23 }
  0x25   :  { %215 = vadd.xlane.f32.xlu0 %v214_v6  ;;  %v208_v8 = vld [vmem:[#allocation3] sm:$0x1]  ;;  %v209_v11 = vld [vmem:[#allocation3 + $0x1] sm:$0x1]  ;;  %p358_p13 = por %p357_p12, %p356_p11 }
  0x27   :  { %p359_p0 = pnand %p358_p13, %p352_p10 }
  0x28   :  { %v52_v26 = vld [vmem:[#allocation2] sm:$0x1]  ;;  %v53_v28 = vld [vmem:[#allocation2 + $0x1] sm:$0x1] }
  0xaa   :  { %v213_v9 = vpop.xlane.xlu0 %212 }
  0xab   :  { %v217_v10 = vadd.f32 %v213_v9, %v208_v8 }
  0xad   :  { %220 = vst.msk [vmem:[#allocation3] sm:$0x1] %vm47_vm1, %v217_v10 }
  0xae   :  { %v216_v12 = vpop.xlane.xlu0 %215 }
  0xaf   :  { %v218_v13 = vadd.f32 %v216_v12, %v209_v11 }
  0xb1   :  { %221 = vst.msk [vmem:[#allocation3 + $0x1] sm:$0x1] %vm47_vm1, %v218_v13 }
  0xb4   :  { %v225_v14 = vld [vmem:[#allocation3] sm:$0x1] }
  0xb5   :  { %v227_v15 = vmax.f32 %v225_v14, 1e-09 }
  0xb7   :  { %307 = vrcp.f32 %v227_v15 }
  0xb8   :  { %v226_v16 = vld [vmem:[#allocation3 + $0x1] sm:$0x1] }
  0xb9   :  { %v228_v17 = vmax.f32 %v226_v16, 1e-09 }
  0xbb   :  { %309 = vrcp.f32 %v228_v17 }
  0xc4   :  { %v308_v18 = vpop.eup %307 }
  0xc5   :  { %v231_v19 = vmul.f32 %v308_v18, %v227_v15 }
  0xc7   :  { %v233_v20 = vsub.f32 2.0, %v231_v19 }
  0xc8   :  { %v310_v21 = vpop.eup %309 }
  0xc9   :  { %v235_v22 = vmul.f32 %v308_v18, %v233_v20  ;;  %v232_v23 = vmul.f32 %v310_v21, %v228_v17 }
  0xcb   :  { %241 = vperm.xlu1 %305, %v235_v22   ;;  %v234_v24 = vsub.f32 2.0, %v232_v23 }
  0xcd   :  { %v236_v25 = vmul.f32 %v310_v21, %v234_v24 }
  0xcf   :  { %250 = vperm.xlu1 %305, %v236_v25  }
  0xe1   :  { %v126_v27 = vpop.f32.mrf.mxu0 }
  0xe2   :  { %v203_v29 = vadd.f32 %v126_v27, %v52_v26  ;;  %v199_v30 = vpop.f32.mrf.mxu1 }
  0xe3   :  { %v289_v31 = vpop.f32.mrf.mxu0  ;;  %v204_v32 = vadd.f32 %v199_v30, %v53_v28 }
  0xe4   :  { %206 = vst.msk [vmem:[#allocation2] sm:$0x1] %vm44_vm4, %v203_v29  ;;  %v294_v33 = vpop.f32.mrf.mxu1 }
  0xe5   :  { %207 = vst.msk [vmem:[#allocation2 + $0x1] sm:$0x1] %vm44_vm4, %v204_v32 }
  0xeb   :  { %v237_v38 = vld [vmem:[#allocation2] sm:$0x1] }
  0xec   :  { %v238_v42 = vld [vmem:[#allocation2 + $0x1] sm:$0x1] }
 0x146   :  { %v242_v37 = vpop.permute.xlu1 %241 }
 0x147   :  { %v247_v39 = vrot.slane %v242_v37, %v246_v36 }
 0x149   :  { %v257_v40 = vmul.f32 %v247_v39, %v237_v38 }
 0x14a   :  { %v251_v41 = vpop.permute.xlu1 %250 }
 0x14b   :  { %259 = vst.msk [vmem:[#allocation9] sm:$0x1] %vm44_vm4, %v257_v40  ;;  %v256_v43 = vrot.slane %v251_v41, %v246_v36 }
 0x14d   :  { %v258_v44 = vmul.f32 %v256_v43, %v238_v42 }
 0x14f   :  { %260 = vst.msk [vmem:[#allocation9 + $0x1] sm:$0x1] %vm44_vm4, %v258_v44 }
 0x150   :  { %362 = shalt.err (!%p359_p0)
}
 0x151   :  { %272 = dma.vmem_to_hbm [thread:$0]  %s267_s1, 32, %s429_s2, [#allocation6], %s381_s19, %s381_s19, %s382_s20  }
 0x152   :  { %375 = dma.done.wait [#allocation6], 32  }
 0x153   :  { %376 = vsyncadd [#allocation6], 4294967264 }
 0x154   :  { %276 = vsyncpa [#allocation5], 1 }
 0x155   :  { %277 = vsyncpa [#allocation8], 1 }
 0x156   :  { %278 = vsyncpa [#allocation6], 1 }

</bundles_post_ra>
